<compile_context>
chip_gen: v5e
topology: v5e:2x2
jax: 0.10.0
libtpu: 0.0.40
codegen_flags: <defaults>
</compile_context>

<pallas_src>
import numpy as np

import jax
import jax.numpy as jnp
from jax import lax
from jax.experimental import pallas as pl
from jax.experimental.pallas import tpu as pltpu


# ----------------------------- Pallas kernel --------------------------------
def conv_block_kernel(x_ref, t0_ref, s0_ref, b0_ref, t1_ref, s1_ref, b1_ref,
                      o_ref):
    """Fused conv3x3+BN+ReLU -> conv3x3+BN+ReLU on lane-dense rows.

    x_ref : (1, H, W*C0)        input rows, one batch element
    t0_ref: (3, W*C0, W*C1)     banded Toeplitz weights for conv0 (bf16)
    t1_ref: (3, W*C1, W*C1)     banded Toeplitz weights for conv1 (bf16)
    s*_ref, b*_ref: (1, W*C1)   folded BN scale / bias, tiled over W (f32)
    o_ref : (1, H, W*C1)        output rows
    """
    H = x_ref.shape[1]

    def conv3x3(a_f32, t_ref):
        """a_f32: (H, W*Cin) f32 lane-dense rows; t_ref: (3, W*Cin, W*Cout).

        out[h] = a[h-1] @ T[0] + a[h] @ T[1] + a[h+1] @ T[2]
        (dx taps + W-direction zero pad live inside the banded T slabs;
         the H-direction zero pad is the explicit zero row in the shifts).
        """
        zero = jnp.zeros((1, a_f32.shape[1]), jnp.float32)
        a_up = jnp.concatenate([zero, a_f32[:-1, :]], axis=0)   # row h-1
        a_dn = jnp.concatenate([a_f32[1:, :], zero], axis=0)    # row h+1
        acc = jnp.dot(a_up.astype(jnp.bfloat16), t_ref[0],
                      preferred_element_type=jnp.float32)
        acc += jnp.dot(a_f32.astype(jnp.bfloat16), t_ref[1],
                       preferred_element_type=jnp.float32)
        acc += jnp.dot(a_dn.astype(jnp.bfloat16), t_ref[2],
                       preferred_element_type=jnp.float32)
        return acc                                               # (H, W*Cout) f32

    x = x_ref[0].astype(jnp.float32)                             # (H, W*C0)

    # conv block 0: conv -> folded-BN affine -> ReLU (all f32 post-matmul)
    y = jnp.maximum(conv3x3(x, t0_ref) * s0_ref[...] + b0_ref[...], 0.0)

    # conv block 1: y never leaves vregs
    z = jnp.maximum(conv3x3(y, t1_ref) * s1_ref[...] + b1_ref[...], 0.0)

    o_ref[0] = z.astype(o_ref.dtype)                             # dense 128-lane store


# ------------------------------ wrapper --------------------------------------
@jax.jit
def conv_block_forward(x_nchw, t0, s0t, b0t, t1, s1t, b1t):
    """x_nchw: (N, C0, H, W) float32  ->  (N, C1, H, W) float32."""
    N, C0, H, W = x_nchw.shape
    WC0 = W * C0
    WC1 = t1.shape[-1]
    C1 = WC1 // W

    # NCHW -> lane-dense rows (N, H, W*C0); no spatial pre-padding needed.
    x_rows = jnp.transpose(x_nchw, (0, 2, 3, 1)).reshape(N, H, WC0)

    out_rows = pl.pallas_call(
        conv_block_kernel,
        out_shape=jax.ShapeDtypeStruct((N, H, WC1), jnp.float32),
        grid_spec=pltpu.PrefetchScalarGridSpec(
            num_scalar_prefetch=0,
            grid=(N,),
            in_specs=[
                pl.BlockSpec((1, H, WC0), lambda n: (n, 0, 0)),
                pl.BlockSpec((3, WC0, WC1), lambda n: (0, 0, 0)),
                pl.BlockSpec((1, WC1), lambda n: (0, 0)),
                pl.BlockSpec((1, WC1), lambda n: (0, 0)),
                pl.BlockSpec((3, WC1, WC1), lambda n: (0, 0, 0)),
                pl.BlockSpec((1, WC1), lambda n: (0, 0)),
                pl.BlockSpec((1, WC1), lambda n: (0, 0)),
            ],
            out_specs=pl.BlockSpec((1, H, WC1), lambda n: (n, 0, 0)),
        ),
        compiler_params=pltpu.CompilerParams(
            dimension_semantics=("parallel",)),
    )(x_rows, t0, s0t, b0t, t1, s1t, b1t)

    out = out_rows.reshape(N, H, W, C1)
    return jnp.transpose(out, (0, 3, 1, 2))                      # -> NCHW


# ------------------- parameter construction & packing -----------------------
def make_params(key, c_in, c_out):
    """Conv2d(c_in, c_out, 3, pad=1) + BatchNorm2d(c_out) folded params."""
    k_w, k_b = jax.random.split(key)
    fan_in = c_in * 3 * 3
    # kaiming_normal_(nonlinearity='relu'): std = sqrt(2 / fan_in), OIHW layout
    w_oihw = jax.random.normal(k_w, (c_out, c_in, 3, 3), jnp.float32) * \
        jnp.sqrt(2.0 / fan_in)
    # default Conv2d bias init: U(-1/sqrt(fan_in), 1/sqrt(fan_in))
    bound = 1.0 / jnp.sqrt(fan_in)
    conv_b = jax.random.uniform(k_b, (c_out,), jnp.float32, -bound, bound)
    # BN defaults: gamma=1, beta=0, running_mean=0, running_var=1, eps=1e-5
    gamma = jnp.ones((c_out,), jnp.float32)
    beta = jnp.zeros((c_out,), jnp.float32)
    r_mean = jnp.zeros((c_out,), jnp.float32)
    r_var = jnp.ones((c_out,), jnp.float32)
    eps = 1e-5
    scale = gamma / jnp.sqrt(r_var + eps)
    bias = beta + scale * (conv_b - r_mean)
    w_hwio = jnp.transpose(w_oihw, (2, 3, 1, 0))  # OIHW -> HWIO
    return w_hwio, scale, bias


def build_toeplitz_weights(w_hwio, W):
    """Pack (3,3,Cin,Cout) conv weights into 3 banded (W*Cin, W*Cout) slabs.

    T[dy, wp*Cin+ci, w*Cout+co] = w_hwio[dy, wp-w+1, ci, co]  for |wp-w| <= 1.
    The band structure realizes both the dx taps and the W-direction zero pad.
    """
    _, _, cin, cout = w_hwio.shape
    T = np.zeros((3, W * cin, W * cout), np.float32)
    wnp = np.asarray(w_hwio)
    for dy in range(3):
        for w in range(W):
            for dx in range(3):
                wp = w + dx - 1
                if 0 <= wp < W:
                    T[dy, wp * cin:(wp + 1) * cin,
                      w * cout:(w + 1) * cout] = wnp[dy, dx]
    return jnp.asarray(T, dtype=jnp.bfloat16)


def tile_affine(v, W):
    """(Cout,) per-channel vector -> (1, W*Cout) lane-dense row."""
    return jnp.tile(v, W).reshape(1, -1).astype(jnp.float32)


# ------------------------------ reference -----------------------------------
def reference_forward(x_nchw, w0_hwio, s0, b0, w1_hwio, s1, b1):
    """Plain-JAX f32 reference (NHWC convs) for verification."""
    x = jnp.transpose(x_nchw, (0, 2, 3, 1))
    dn = lax.conv_dimension_numbers(x.shape, w0_hwio.shape,
                                    ("NHWC", "HWIO", "NHWC"))
    y = lax.conv_general_dilated(x, w0_hwio, (1, 1), "SAME",
                                 dimension_numbers=dn)
    y = jnp.maximum(y * s0 + b0, 0.0)
    dn2 = lax.conv_dimension_numbers(y.shape, w1_hwio.shape,
                                     ("NHWC", "HWIO", "NHWC"))
    z = lax.conv_general_dilated(y, w1_hwio, (1, 1), "SAME",
                                 dimension_numbers=dn2)
    z = jnp.maximum(z * s1 + b1, 0.0)
    return jnp.transpose(z, (0, 3, 1, 2))


if __name__ == "__main__":
    key = jax.random.PRNGKey(0)
    k_x, k_p0, k_p1 = jax.random.split(key, 3)

    N, C0, C1, H, W = 2, 4, 8, 16, 16          # ConvBlock(channel=[4, 8])
    x = jax.random.normal(k_x, (N, C0, H, W), jnp.float32)

    w0, s0, b0 = make_params(k_p0, C0, C1)      # conv_block0: C0 -> C1
    w1, s1, b1 = make_params(k_p1, C1, C1)      # conv_block1: C1 -> C1

    # Round matmul operands to bf16-representable values so the f32 reference
    # and the bf16-MXU kernel see identical inputs (only the intermediate's
    # bf16 rounding and accumulation order differ).
    q = lambda a: a.astype(jnp.bfloat16).astype(jnp.float32)
    x, w0, w1 = q(x), q(w0), q(w1)

    # Pack kernel parameters (host-side, once).
    t0 = build_toeplitz_weights(w0, W)
    t1 = build_toeplitz_weights(w1, W)
    s0t, b0t = tile_affine(s0, W), tile_affine(b0, W)
    s1t, b1t = tile_affine(s1, W), tile_affine(b1, W)

    out = conv_block_forward(x, t0, s0t, b0t, t1, s1t, b1t)
    out = jax.block_until_ready(out)

    ref = reference_forward(x, w0, s0, b0, w1, s1, b1)
    assert out.shape == (N, C1, H, W), out.shape
    max_err = float(jnp.max(jnp.abs(out - ref)))
    assert jnp.allclose(out, ref, atol=5e-2, rtol=5e-2), max_err

    print("KERNEL_OK")
</pallas_src>

<mosaic_0001>
module attributes {stable_mosaic.version = 11 : i64} {
  func.func @conv_block_kernel(%arg0: i32, %arg1: memref<1x16x64xf32, #tpu.memory_space<vmem>>, %arg2: memref<3x64x128xbf16, #tpu.memory_space<vmem>>, %arg3: memref<1x128xf32, #tpu.memory_space<vmem>>, %arg4: memref<1x128xf32, #tpu.memory_space<vmem>>, %arg5: memref<3x128x128xbf16, #tpu.memory_space<vmem>>, %arg6: memref<1x128xf32, #tpu.memory_space<vmem>>, %arg7: memref<1x128xf32, #tpu.memory_space<vmem>>, %arg8: memref<1x16x128xf32, #tpu.memory_space<vmem>>) attributes {dimension_semantics = [#tpu.dimension_semantics<parallel>], iteration_bounds = array<i64: 2>, scalar_prefetch = 0 : i64, scratch_operands = 0 : i64, tpu.core_type = #tpu.core_type<tc>, window_params = [{transform_indices = @transform_0, window_bounds = array<i64: 1, 16, 64>}, {pipeline_mode = #tpu.pipeline_mode<synchronous>, transform_indices = @transform_1, window_bounds = array<i64: 3, 64, 128>}, {pipeline_mode = #tpu.pipeline_mode<synchronous>, transform_indices = @transform_2, window_bounds = array<i64: 1, 128>}, {pipeline_mode = #tpu.pipeline_mode<synchronous>, transform_indices = @transform_3, window_bounds = array<i64: 1, 128>}, {pipeline_mode = #tpu.pipeline_mode<synchronous>, transform_indices = @transform_4, window_bounds = array<i64: 3, 128, 128>}, {pipeline_mode = #tpu.pipeline_mode<synchronous>, transform_indices = @transform_5, window_bounds = array<i64: 1, 128>}, {pipeline_mode = #tpu.pipeline_mode<synchronous>, transform_indices = @transform_6, window_bounds = array<i64: 1, 128>}, {transform_indices = @transform_7, window_bounds = array<i64: 1, 16, 128>}]} {
    %c0 = arith.constant 0 : index
    %c0_0 = arith.constant 0 : index
    %c0_1 = arith.constant 0 : index
    %0 = vector.load %arg1[%c0, %c0_0, %c0_1] : memref<1x16x64xf32, #tpu.memory_space<vmem>>, vector<1x16x64xf32>
    %1 = vector.shape_cast %0 : vector<1x16x64xf32> to vector<16x64xf32>
    %cst = arith.constant 0.000000e+00 : f32
    %2 = vector.broadcast %cst : f32 to vector<1x64xf32>
    %3 = vector.extract_strided_slice %1 {offsets = [0, 0], sizes = [15, 64], strides = [1, 1]} : vector<16x64xf32> to vector<15x64xf32>
    %4 = tpu.concatenate %2, %3 in 0 : vector<1x64xf32>, vector<15x64xf32> -> vector<16x64xf32>
    %5 = vector.extract_strided_slice %1 {offsets = [1, 0], sizes = [15, 64], strides = [1, 1]} : vector<16x64xf32> to vector<15x64xf32>
    %6 = tpu.concatenate %5, %2 in 0 : vector<15x64xf32>, vector<1x64xf32> -> vector<16x64xf32>
    %7 = arith.truncf %4 : vector<16x64xf32> to vector<16x64xbf16>
    %c0_2 = arith.constant 0 : index
    %c0_3 = arith.constant 0 : index
    %c0_4 = arith.constant 0 : index
    %8 = vector.load %arg2[%c0_2, %c0_3, %c0_4] : memref<3x64x128xbf16, #tpu.memory_space<vmem>>, vector<1x64x128xbf16>
    %9 = vector.shape_cast %8 : vector<1x64x128xbf16> to vector<64x128xbf16>
    %cst_5 = arith.constant dense<0.000000e+00> : vector<16x128xf32>
    %10 = tpu.matmul %7, %9, %cst_5 {dimension_numbers = #tpu.dot_dimension_numbers<[1], [0], [0], [1], [0, 0, 1, 1], [], []>} : vector<16x64xbf16>, vector<64x128xbf16>, vector<16x128xf32> -> vector<16x128xf32>
    %11 = arith.truncf %1 : vector<16x64xf32> to vector<16x64xbf16>
    %c1 = arith.constant 1 : index
    %c0_6 = arith.constant 0 : index
    %c0_7 = arith.constant 0 : index
    %12 = vector.load %arg2[%c1, %c0_6, %c0_7] : memref<3x64x128xbf16, #tpu.memory_space<vmem>>, vector<1x64x128xbf16>
    %13 = vector.shape_cast %12 : vector<1x64x128xbf16> to vector<64x128xbf16>
    %cst_8 = arith.constant dense<0.000000e+00> : vector<16x128xf32>
    %14 = tpu.matmul %11, %13, %cst_8 {dimension_numbers = #tpu.dot_dimension_numbers<[1], [0], [0], [1], [0, 0, 1, 1], [], []>} : vector<16x64xbf16>, vector<64x128xbf16>, vector<16x128xf32> -> vector<16x128xf32>
    %15 = arith.addf %10, %14 : vector<16x128xf32>
    %16 = arith.truncf %6 : vector<16x64xf32> to vector<16x64xbf16>
    %c2 = arith.constant 2 : index
    %c0_9 = arith.constant 0 : index
    %c0_10 = arith.constant 0 : index
    %17 = vector.load %arg2[%c2, %c0_9, %c0_10] : memref<3x64x128xbf16, #tpu.memory_space<vmem>>, vector<1x64x128xbf16>
    %18 = vector.shape_cast %17 : vector<1x64x128xbf16> to vector<64x128xbf16>
    %cst_11 = arith.constant dense<0.000000e+00> : vector<16x128xf32>
    %19 = tpu.matmul %16, %18, %cst_11 {dimension_numbers = #tpu.dot_dimension_numbers<[1], [0], [0], [1], [0, 0, 1, 1], [], []>} : vector<16x64xbf16>, vector<64x128xbf16>, vector<16x128xf32> -> vector<16x128xf32>
    %20 = arith.addf %15, %19 : vector<16x128xf32>
    %c0_12 = arith.constant 0 : index
    %c0_13 = arith.constant 0 : index
    %21 = vector.load %arg3[%c0_12, %c0_13] : memref<1x128xf32, #tpu.memory_space<vmem>>, vector<1x128xf32>
    %22 = vector.broadcast %21 : vector<1x128xf32> to vector<16x128xf32>
    %23 = arith.mulf %20, %22 : vector<16x128xf32>
    %c0_14 = arith.constant 0 : index
    %c0_15 = arith.constant 0 : index
    %24 = vector.load %arg4[%c0_14, %c0_15] : memref<1x128xf32, #tpu.memory_space<vmem>>, vector<1x128xf32>
    %25 = vector.broadcast %24 : vector<1x128xf32> to vector<16x128xf32>
    %26 = arith.addf %23, %25 : vector<16x128xf32>
    %cst_16 = arith.constant 0.000000e+00 : f32
    %27 = vector.broadcast %cst_16 : f32 to vector<16x128xf32>
    %28 = arith.maximumf %26, %27 : vector<16x128xf32>
    %cst_17 = arith.constant 0.000000e+00 : f32
    %29 = vector.broadcast %cst_17 : f32 to vector<1x128xf32>
    %30 = vector.extract_strided_slice %28 {offsets = [0, 0], sizes = [15, 128], strides = [1, 1]} : vector<16x128xf32> to vector<15x128xf32>
    %31 = tpu.concatenate %29, %30 in 0 : vector<1x128xf32>, vector<15x128xf32> -> vector<16x128xf32>
    %32 = vector.extract_strided_slice %28 {offsets = [1, 0], sizes = [15, 128], strides = [1, 1]} : vector<16x128xf32> to vector<15x128xf32>
    %33 = tpu.concatenate %32, %29 in 0 : vector<15x128xf32>, vector<1x128xf32> -> vector<16x128xf32>
    %34 = arith.truncf %31 : vector<16x128xf32> to vector<16x128xbf16>
    %c0_18 = arith.constant 0 : index
    %c0_19 = arith.constant 0 : index
    %c0_20 = arith.constant 0 : index
    %35 = vector.load %arg5[%c0_18, %c0_19, %c0_20] : memref<3x128x128xbf16, #tpu.memory_space<vmem>>, vector<1x128x128xbf16>
    %36 = vector.shape_cast %35 : vector<1x128x128xbf16> to vector<128x128xbf16>
    %cst_21 = arith.constant dense<0.000000e+00> : vector<16x128xf32>
    %37 = tpu.matmul %34, %36, %cst_21 {dimension_numbers = #tpu.dot_dimension_numbers<[1], [0], [0], [1], [0, 0, 1, 1], [], []>} : vector<16x128xbf16>, vector<128x128xbf16>, vector<16x128xf32> -> vector<16x128xf32>
    %38 = arith.truncf %28 : vector<16x128xf32> to vector<16x128xbf16>
    %c1_22 = arith.constant 1 : index
    %c0_23 = arith.constant 0 : index
    %c0_24 = arith.constant 0 : index
    %39 = vector.load %arg5[%c1_22, %c0_23, %c0_24] : memref<3x128x128xbf16, #tpu.memory_space<vmem>>, vector<1x128x128xbf16>
    %40 = vector.shape_cast %39 : vector<1x128x128xbf16> to vector<128x128xbf16>
    %cst_25 = arith.constant dense<0.000000e+00> : vector<16x128xf32>
    %41 = tpu.matmul %38, %40, %cst_25 {dimension_numbers = #tpu.dot_dimension_numbers<[1], [0], [0], [1], [0, 0, 1, 1], [], []>} : vector<16x128xbf16>, vector<128x128xbf16>, vector<16x128xf32> -> vector<16x128xf32>
    %42 = arith.addf %37, %41 : vector<16x128xf32>
    %43 = arith.truncf %33 : vector<16x128xf32> to vector<16x128xbf16>
    %c2_26 = arith.constant 2 : index
    %c0_27 = arith.constant 0 : index
    %c0_28 = arith.constant 0 : index
    %44 = vector.load %arg5[%c2_26, %c0_27, %c0_28] : memref<3x128x128xbf16, #tpu.memory_space<vmem>>, vector<1x128x128xbf16>
    %45 = vector.shape_cast %44 : vector<1x128x128xbf16> to vector<128x128xbf16>
    %cst_29 = arith.constant dense<0.000000e+00> : vector<16x128xf32>
    %46 = tpu.matmul %43, %45, %cst_29 {dimension_numbers = #tpu.dot_dimension_numbers<[1], [0], [0], [1], [0, 0, 1, 1], [], []>} : vector<16x128xbf16>, vector<128x128xbf16>, vector<16x128xf32> -> vector<16x128xf32>
    %47 = arith.addf %42, %46 : vector<16x128xf32>
    %c0_30 = arith.constant 0 : index
    %c0_31 = arith.constant 0 : index
    %48 = vector.load %arg6[%c0_30, %c0_31] : memref<1x128xf32, #tpu.memory_space<vmem>>, vector<1x128xf32>
    %49 = vector.broadcast %48 : vector<1x128xf32> to vector<16x128xf32>
    %50 = arith.mulf %47, %49 : vector<16x128xf32>
    %c0_32 = arith.constant 0 : index
    %c0_33 = arith.constant 0 : index
    %51 = vector.load %arg7[%c0_32, %c0_33] : memref<1x128xf32, #tpu.memory_space<vmem>>, vector<1x128xf32>
    %52 = vector.broadcast %51 : vector<1x128xf32> to vector<16x128xf32>
    %53 = arith.addf %50, %52 : vector<16x128xf32>
    %cst_34 = arith.constant 0.000000e+00 : f32
    %54 = vector.broadcast %cst_34 : f32 to vector<16x128xf32>
    %55 = arith.maximumf %53, %54 : vector<16x128xf32>
    %c0_35 = arith.constant 0 : index
    %c0_36 = arith.constant 0 : index
    %c0_37 = arith.constant 0 : index
    %56 = vector.load %arg8[%c0_35, %c0_36, %c0_37] : memref<1x16x128xf32, #tpu.memory_space<vmem>>, vector<1x16x128xf32>
    %57 = vector.shape_cast %56 : vector<1x16x128xf32> to vector<16x128xf32>
    %58 = vector.shape_cast %55 : vector<16x128xf32> to vector<1x16x128xf32>
    tpu.vector_store %arg8[%c0_35, %c0_36, %c0_37], %58 {strides = array<i32>} : memref<1x16x128xf32, #tpu.memory_space<vmem>>, vector<1x16x128xf32>,
    return
  }
  func.func @transform_0(%arg0: i32) -> (i32, i32, i32) {
    %c0_i32 = arith.constant 0 : i32
    %c0_i32_0 = arith.constant 0 : i32
    %c0_i32_1 = arith.constant 0 : i32
    return %arg0, %c0_i32, %c0_i32_0 : i32, i32, i32
  }
  func.func @transform_1(%arg0: i32) -> (i32, i32, i32) {
    %c0_i32 = arith.constant 0 : i32
    %c0_i32_0 = arith.constant 0 : i32
    %c0_i32_1 = arith.constant 0 : i32
    %c0_i32_2 = arith.constant 0 : i32
    return %c0_i32, %c0_i32_0, %c0_i32_1 : i32, i32, i32
  }
  func.func @transform_2(%arg0: i32) -> (i32, i32) {
    %c0_i32 = arith.constant 0 : i32
    %c0_i32_0 = arith.constant 0 : i32
    %c0_i32_1 = arith.constant 0 : i32
    return %c0_i32, %c0_i32_0 : i32, i32
  }
  func.func @transform_3(%arg0: i32) -> (i32, i32) {
    %c0_i32 = arith.constant 0 : i32
    %c0_i32_0 = arith.constant 0 : i32
    %c0_i32_1 = arith.constant 0 : i32
    return %c0_i32, %c0_i32_0 : i32, i32
  }
  func.func @transform_4(%arg0: i32) -> (i32, i32, i32) {
    %c0_i32 = arith.constant 0 : i32
    %c0_i32_0 = arith.constant 0 : i32
    %c0_i32_1 = arith.constant 0 : i32
    %c0_i32_2 = arith.constant 0 : i32
    return %c0_i32, %c0_i32_0, %c0_i32_1 : i32, i32, i32
  }
  func.func @transform_5(%arg0: i32) -> (i32, i32) {
    %c0_i32 = arith.constant 0 : i32
    %c0_i32_0 = arith.constant 0 : i32
    %c0_i32_1 = arith.constant 0 : i32
    return %c0_i32, %c0_i32_0 : i32, i32
  }
  func.func @transform_6(%arg0: i32) -> (i32, i32) {
    %c0_i32 = arith.constant 0 : i32
    %c0_i32_0 = arith.constant 0 : i32
    %c0_i32_1 = arith.constant 0 : i32
    return %c0_i32, %c0_i32_0 : i32, i32
  }
  func.func @transform_7(%arg0: i32) -> (i32, i32, i32) {
    %c0_i32 = arith.constant 0 : i32
    %c0_i32_0 = arith.constant 0 : i32
    %c0_i32_1 = arith.constant 0 : i32
    return %arg0, %c0_i32, %c0_i32_0 : i32, i32, i32
  }
}

</mosaic_0001>

<bundles_post_ra>
// kernel: conv_block_forward.1
= control target key start
LH: loop header
LB: loop body
LE: loop exit
PB: predicated region body
PF: predicated region fallthrough
CT: control target
= control target key end

     0   :  { %s1106_s24 = smov 0   ;;  %s1261_s0 = inlined_call_operand.vmem [shape: f32[2,16,64], index: 0, kind: input, shape index: {}]   ;;  %s1262_s1 = inlined_call_operand.vmem [shape: bf16[3,64,128], index: 1, kind: input, shape index: {}]   ;;  %s1263_s2 = inlined_call_operand.vmem [shape: f32[1,128], index: 2, kind: input, shape index: {}]   ;;  %s1264_s3 = inlined_call_operand.vmem [shape: f32[1,128], index: 3, kind: input, shape index: {}]   ;;  %s1265_s4 = inlined_call_operand.vmem [shape: bf16[3,128,128], index: 4, kind: input, shape index: {}]   ;;  %s1266_s5 = inlined_call_operand.vmem [shape: f32[1,128], index: 5, kind: input, shape index: {}]   ;;  %s1267_s6 = inlined_call_operand.vmem [shape: f32[1,128], index: 6, kind: input, shape index: {}]   ;;  %s1268_s7 = inlined_call_operand.vmem [shape: f32[2,16,128], index: 7, kind: output, shape index: {}]  }
   0x1 LB: > { %s793_s25 = sadd.s32 4294967295, %s1063_s24   ;;  %p797_p0 = scmp.ge.s32.totalorder %s1063_s24, 1  ;;  %s1063_s24 = sphi %s1106_s24, %s17_s24  }
   0x2   : > { %p237_p1 = scmp.lt.s32.totalorder %s1063_s24, 3 }
   0x4   : > { %p238_p2 = pnand %p797_p0, %p237_p1 }
   0x5   : > { %p269_p3 = scmp.lt.s32.totalorder (!%p238_p2), %s793_s25, 1 }
   0x6   : > { %241 = sbr.rel (%p238_p2) target bundleno = 344 (0x158), region = 48 }
   0xb   : > { %v1015_v0 = vld [vmem:[%s1262_s1 + $0x38] sm:$0xff]  ;;  %v1014_v2 = vld [vmem:[%s1262_s1 + $0x30] sm:$0xff]  ;;  %s1270_s25 = smov (!%p269_p3, %s793_s25), 1  ;;  %v1013_v4 = vld [vmem:[%s1262_s1 + $0x28] sm:$0xff]  ;;  %vm284_vm0 = vcmask 1040384   ;;  %vm341_vm1 = vcmask 523264  }
   0xc   : > { %v1011_v1 = vld [vmem:[%s1262_s1 + $0x18] sm:$0xff]  ;;  %349 = vmatpush.bf16.msra.mxu2 %v1015_v0  ;;  %v1010_v3 = vld [vmem:[%s1262_s1 + $0x10] sm:$0xff]  ;;  %s1006_s11 = sshll.u32 %s1270_s25, 4  ;;  %v1009_v5 = vld [vmem:[%s1262_s1 + $0x8] sm:$0xff]  ;;  %vm291_vm2 = vcmask 1046528   ;;  %vm1065_vm4 = vmmov 1  }
   0xd   : > { %390 = vmatpush.bf16.msra.mxu1 %v1011_v1  ;;  %s273_s14 = scalar_lea.vmem %s1261_s0, %s1006_s11  ;;  %v1012_v10 = vld [vmem:[%s1262_s1 + $0x20] sm:$0xff]  ;;  %v1019_v14 = vld [vmem:[%s1262_s1 + $0x58] sm:$0xff]  ;;  %v1018_v17 = vld [vmem:[%s1262_s1 + $0x50] sm:$0xff]  ;;  %s278_s8 = scalar_lea.vmem %s1268_s7, %s1006_s11 }
   0xe   : > { %v281_v6 = vld [vmem:[%s273_s14 + $0x8] sm:$0xff]  ;;  %v280_v7 = vld [vmem:[%s273_s14] sm:$0xff]  ;;  %v1035_v25 = vld [vmem:[%s1265_s4 + $0x78] sm:$0xff] }
   0xf   : > { %v286_v8 = vrot.slane %v281_v6, 7  ;;  %v285_v9 = vrot.slane %v280_v7, 7  ;;  %v1008_v11 = vld [vmem:[%s1262_s1] sm:$0xff]  ;;  %v307_v15 = vpack.c.bf16 %v281_v6, %v280_v7  ;;  %v1017_v18 = vld [vmem:[%s1262_s1 + $0x48] sm:$0xff]  ;;  %v292_v19 = vrot.slane %v280_v7, 1  ;;  %v1027_v26 = vld [vmem:[%s1265_s4 + $0x38] sm:$0xff]  ;;  %564 = vmatpush.bf16.msra.mxu3 %v1035_v25 }
  0x10   : > { %350 = vmatpush.bf16.msra.mxu2 %v1014_v2  ;;  %v293_v20 = vrot.slane %v281_v6, 1  ;;  %v1016_v21 = vld [vmem:[%s1262_s1 + $0x40] sm:$0xff]  ;;  %v1043_v27 = vld [vmem:[%s1265_s4 + $0xb8] sm:$0xff]  ;;  %626 = vmatpush.bf16.msra.mxu0 %v1027_v26  ;;  %v1034_v28 = vld [vmem:[%s1265_s4 + $0x70] sm:$0xff] }
  0x11   : > { %391 = vmatpush.bf16.msra.mxu1 %v1010_v3  ;;  %v287_v12 = vsel %vm284_vm0, %v285_v9, %v286_v8  ;;  %v290_v13 = vsel %vm284_vm0, 0.0, %v285_v9  ;;  %v1026_v29 = vld [vmem:[%s1265_s4 + $0x30] sm:$0xff]  ;;  %v1033_v31 = vld [vmem:[%s1265_s4 + $0x68] sm:$0xff]  ;;  %v1032_v34 = vld [vmem:[%s1265_s4 + $0x60] sm:$0xff] }
  0x12   : > { %v298_v16 = vpack.c.bf16 %v287_v12, %v290_v13  ;;  %v294_v22 = vsel %vm291_vm2, %v292_v19, %v293_v20  ;;  %v297_v23 = vsel %vm291_vm2, %v293_v20, 0.0  ;;  %v1042_v30 = vld [vmem:[%s1265_s4 + $0xb0] sm:$0xff]  ;;  %v1025_v32 = vld [vmem:[%s1265_s4 + $0x28] sm:$0xff]  ;;  %v1024_v35 = vld [vmem:[%s1265_s4 + $0x20] sm:$0xff] }
  0x13   : > { %v400_v24 = vpack.c.bf16 %v297_v23, %v294_v22  ;;  %565 = vmatpush.bf16.msra.mxu3 %v1034_v28  ;;  %v1041_v33 = vld [vmem:[%s1265_s4 + $0xa8] sm:$0xff]  ;;  %v1040_v36 = vld [vmem:[%s1265_s4 + $0xa0] sm:$0xff]  ;;  %v1031_v37 = vld [vmem:[%s1265_s4 + $0x58] sm:$0xff] }
  0x14   : > { %351 = vmatpush.bf16.msra.mxu2 %v1013_v4  ;;  %627 = vmatpush.bf16.msra.mxu0 %v1026_v29  ;;  %v1023_v38 = vld [vmem:[%s1265_s4 + $0x18] sm:$0xff]  ;;  %v1030_v40 = vld [vmem:[%s1265_s4 + $0x50] sm:$0xff]  ;;  %v1029_v43 = vld [vmem:[%s1265_s4 + $0x48] sm:$0xff] }
  0x15   : > { %392 = vmatpush.bf16.msra.mxu1 %v1009_v5  ;;  %v1039_v39 = vld [vmem:[%s1265_s4 + $0x98] sm:$0xff]  ;;  %v1022_v41 = vld [vmem:[%s1265_s4 + $0x10] sm:$0xff]  ;;  %v1021_v44 = vld [vmem:[%s1265_s4 + $0x8] sm:$0xff] }
  0x16   : > { %v1038_v42 = vld [vmem:[%s1265_s4 + $0x90] sm:$0xff]  ;;  %v1037_v45 = vld [vmem:[%s1265_s4 + $0x88] sm:$0xff]  ;;  %v1028_v46 = vld [vmem:[%s1265_s4 + $0x40] sm:$0xff] }
  0x17   : > { %566 = vmatpush.bf16.msra.mxu3 %v1033_v31  ;;  %v1020_v48 = vld [vmem:[%s1265_s4] sm:$0xff]  ;;  %vm949_vm3 = vmneg %vm284_vm0 }
  0x18   : > { %352 = vmatpush.bf16.msra.mxu2 %v1012_v10  ;;  %628 = vmatpush.bf16.msra.mxu0 %v1025_v32  ;;  %v1036_v49 = vld [vmem:[%s1265_s4 + $0x80] sm:$0xff]  ;;  %vm950_vm5 = vmpackc.low %vm1065_vm4, %vm949_vm3 }
  0x19   : > { %393 = vmatpush.bf16.msra.mxu1 %v1008_v11  ;;  %v1053_v54 = vld [vmem:[%s1263_s2] ss:$0 sm:$0xff]  ;;  %vm1001_vm6 = vmpackc.low %vm291_vm2, %vm1065_vm4 }
  0x1a   : > { %v1054_v58 = vld [vmem:[%s1264_s3] ss:$0 sm:$0xff] }
  0x1b   : > { %826 = vmatmul.msk.bf16.vlgmr.msra.gmra.mxu2 %vm341_vm1, %v307_v15  ;;  %567 = vmatpush.bf16.msra.mxu3 %v1032_v34 }
  0x1c   : > { %441 = vmatpush.bf16.msrb.mxu2 %v1019_v14  ;;  %843 = vmatmul.msk.bf16.vlgmr.msra.gmra.mxu1 %vm341_vm1, %v298_v16  ;;  %v1055_v16 = vld [vmem:[%s1266_s5] ss:$0 sm:$0xff] }
  0x1d   : > { %706 = vmatpush.bf16.msrb.mxu1 %v1043_v27  ;;  %629 = vmatpush.bf16.msra.mxu0 %v1024_v35 }
  0x1f   : > { %568 = vmatpush.bf16.msra.mxu3 %v1031_v37 }
  0x20   : > { %442 = vmatpush.bf16.msrb.mxu2 %v1018_v17 }
  0x21   : > { %707 = vmatpush.bf16.msrb.mxu1 %v1042_v30  ;;  %630 = vmatpush.bf16.msra.mxu0 %v1023_v38 }
  0x23   : > { %569 = vmatpush.bf16.msra.mxu3 %v1030_v40 }
  0x24   : > { %443 = vmatpush.bf16.msrb.mxu2 %v1017_v18  ;;  %v1056_v18 = vld [vmem:[%s1267_s6] ss:$0 sm:$0xff] }
  0x25   : > { %708 = vmatpush.bf16.msrb.mxu1 %v1041_v33  ;;  %631 = vmatpush.bf16.msra.mxu0 %v1022_v41 }
  0x27   : > { %570 = vmatpush.bf16.msra.mxu3 %v1029_v43 }
  0x28   : > { %444 = vmatpush.bf16.msrb.mxu2 %v1016_v21 }
  0x29   : > { %709 = vmatpush.bf16.msrb.mxu1 %v1040_v36  ;;  %632 = vmatpush.bf16.msra.mxu0 %v1021_v44 }
  0x2b   : > { %868 = vmatmul.msk.bf16.vlgmr.msrb.gmra.mxu2 %vm341_vm1, %v400_v24  ;;  %571 = vmatpush.bf16.msra.mxu3 %v1028_v46 }
  0x2d   : > { %710 = vmatpush.bf16.msrb.mxu1 %v1039_v39  ;;  %633 = vmatpush.bf16.msra.mxu0 %v1020_v48 }
  0x31   : > { %711 = vmatpush.bf16.msrb.mxu1 %v1038_v42 }
  0x35   : > { %712 = vmatpush.bf16.msrb.mxu1 %v1037_v45 }
  0x39   : > { %713 = vmatpush.bf16.msrb.mxu1 %v1036_v49 }
  0x99   : > { %v395_v51 = vpop.f32.mrf.mxu1 }
  0x9e   : > { %v354_v47 = vpop.f32.mrf.mxu2 }
  0x9f   : > { %v396_v52 = vadd.f32 %v395_v51, %v354_v47 }
  0xa1   : > { %v397_v56 = vpop.f32.mrf.mxu1 }
  0xa6   : > { %v356_v50 = vpop.f32.mrf.mxu2 }
  0xa7   : > { %v398_v59 = vadd.f32 %v397_v56, %v356_v50 }
  0xae   : > { %v446_v53 = vpop.f32.mrf.mxu2 }
  0xaf   : > { %v451_v55 = vadd.f32 %v446_v53, %v396_v52 }
  0xb1   : > { %v457_v57 = vmul.f32 %v1053_v54, %v451_v55 }
  0xb3   : > { %v463_v60 = vadd.f32 %v1054_v58, %v457_v57 }
  0xb5   : > { %v465_v0 = vmax.f32 %v463_v60, 0.0 }
  0xb6   : > { %v448_v61 = vpop.f32.mrf.mxu2 }
  0xb7   : > { %v452_v62 = vadd.f32 %v448_v61, %v398_v59  ;;  %v475_v3 = vrot.slane %v465_v0, 1  ;;  %v469_v5 = vrot.slane %v465_v0, 7 }
  0xb9   : > { %v458_v63 = vmul.f32 %v1053_v54, %v452_v62 }
  0xbb   : > { %v464_v1 = vadd.f32 %v1054_v58, %v458_v63 }
  0xbd   : > { %v466_v2 = vmax.f32 %v464_v1, 0.0 }
  0xbf   : > { %v498_v4 = vpack.c.bf16 %v466_v2, %v465_v0  ;;  %v470_v6 = vrot.slane %v466_v2, 7  ;;  %v476_v7 = vrot.slane %v466_v2, 1 }
  0xc1   : > { %572 = vmatmul.bf16.vlgmr.msra.gmra.mxu3 %v498_v4  ;;  %v471_v8 = vsel %vm284_vm0, %v469_v5, %v470_v6  ;;  %v477_v9 = vsel %vm291_vm2, %v475_v3, %v476_v7 }
  0xc2   : > { %v951_v10 = vpack.c.bf16 %v471_v8, %v469_v5  ;;  %v1002_v11 = vpack.c.bf16 %v476_v7, %v477_v9 }
  0xc4   : > { %952 = vmatmul.msk.bf16.vlgmr.msra.gmra.mxu0 %vm950_vm5, %v951_v10  ;;  %1003 = vmatmul.msk.bf16.vlgmr.msrb.gmra.mxu1 %vm1001_vm6, %v1002_v11 }
 0x141   : > { %v635_v12 = vpop.f32.mrf.mxu0  ;;  %v715_v13 = vpop.f32.mrf.mxu1 }
 0x144   : > { %v573_v14 = vpop.f32.mrf.mxu3 }
 0x145   : > { %v636_v15 = vadd.f32 %v635_v12, %v573_v14 }
 0x147   : > { %v720_v17 = vadd.f32 %v715_v13, %v636_v15 }
 0x149   : > { %v726_v19 = vmul.f32 %v1055_v16, %v720_v17  ;;  %v637_v21 = vpop.f32.mrf.mxu0  ;;  %v717_v25 = vpop.f32.mrf.mxu1 }
 0x14b   : > { %v732_v20 = vadd.f32 %v1056_v18, %v726_v19 }
 0x14c   : > { %v575_v22 = vpop.f32.mrf.mxu3 }
 0x14d   : > { %v734_v23 = vmax.f32 %v732_v20, 0.0  ;;  %v638_v24 = vadd.f32 %v637_v21, %v575_v22 }
 0x14f   : > { %736 = vst [vmem:[%s278_s8] sm:$0xff] %v734_v23  ;;  %v721_v26 = vadd.f32 %v717_v25, %v638_v24 }
 0x151   : > { %v727_v27 = vmul.f32 %v1055_v16, %v721_v26 }
 0x153   : > { %v733_v28 = vadd.f32 %v1056_v18, %v727_v27 }
 0x155   : > { %v735_v29 = vmax.f32 %v733_v28, 0.0 }
 0x157   : > { %737 = vst [vmem:[%s278_s8 + $0x8] sm:$0xff] %v735_v29 }
 0x158 PF: > { %s17_s24 = sadd.s32 1, %s1063_s24  }
 0x159   : > { %p14_p4 = scmp.ge.s32.totalorder %s17_s24, 4  }
 0x15b   :  { %16 = sbr.rel (!%p14_p4) target bundleno = 1 (0x1), region = 82 }

</bundles_post_ra>
